<compile_context>
chip_gen: v6e
topology: v6e:2x2x1
jax: 0.10.0
libtpu: 0.0.40
codegen_flags: <defaults>
</compile_context>

<pallas_src>
import jax
import jax.numpy as jnp
from jax.experimental import pallas as pl
from jax.experimental.pallas import tpu as pltpu


def _round_up(x, m):
    return ((x + m - 1) // m) * m


def _pick_tiles(n_pad):
    """Row / K tile sizes. n_pad is a multiple of 128."""
    if n_pad <= 128:
        return n_pad, n_pad
    # Row (parallel) axis: keep >= 2 tiles so both TensorCores get work on 2-TC chips.
    tm = 128
    for cand in (512, 256, 128):
        if n_pad % cand == 0 and n_pad // cand >= 2:
            tm = cand
            break
    # K (reduction) axis: as large as divides n_pad (amortizes per-step grid overhead).
    tk = 128
    for cand in (2048, 1024, 512, 256, 128):
        if n_pad % cand == 0:
            tk = cand
            break
    return tm, tk


def _sage_layer_kernel(a_ref, x_ref, invdeg_ref, wl_ref, wr_ref, b_ref, o_ref, acc_ref):
    """One (row_tile, k_tile) grid step of relu( (A@X)*invdeg @ W_l + X_i @ W_r + b )."""
    tm, tk = a_ref.shape
    i = pl.program_id(0)
    k = pl.program_id(1)

    @pl.when(k == 0)
    def _():
        acc_ref[...] = jnp.zeros_like(acc_ref)

    # Aggregation partial sum on the MXU. A is int8 0/1 counts in HBM/VMEM (half the
    # DMA bytes of bf16); upcast to bf16 in-register just before the dot.
    k_start = pl.multiple_of(k * tk, tk)
    xk = x_ref[pl.ds(k_start, tk), :]                       # (tk, Fin_p) bf16, resident X
    a_bf16 = a_ref[...].astype(jnp.bfloat16)                # (tm, tk)
    acc_ref[...] += jnp.dot(a_bf16, xk, preferred_element_type=jnp.float32)

    @pl.when(k == pl.num_programs(1) - 1)
    def _():
        # Mean aggregation: scale the f32 edge-count sums by 1/in-degree.
        agg = (acc_ref[...] * invdeg_ref[...]).astype(jnp.bfloat16)   # (tm, Fin_p)
        i_start = pl.multiple_of(i * tm, tm)
        xi = x_ref[pl.ds(i_start, tm), :]                             # (tm, Fin_p) root feats
        h = jnp.dot(agg, wl_ref[...], preferred_element_type=jnp.float32)
        h = h + jnp.dot(xi, wr_ref[...], preferred_element_type=jnp.float32)
        h = h + b_ref[...]
        o_ref[...] = jnp.maximum(h, 0.0).astype(o_ref.dtype)          # F.relu


def sage_layer(adj_i8, x, inv_deg, w_l, w_r, b2d, *, out_dtype):
    """One SAGEConv (mean aggr) layer + ReLU as a tiled Pallas kernel.

    adj_i8:  (Np, Np)     int8 unnormalized 0/1 edge counts (padded)
    x:       (Np, Fin_p)  bf16 node features (padded, 128-lane aligned)
    inv_deg: (Np, 1)      f32 inverse in-degree (0 for isolated / padded nodes)
    w_l:     (Fin_p, Fout_p) bf16 aggregation weight
    w_r:     (Fin_p, Fout_p) bf16 root weight
    b2d:     (1, Fout_p)  f32 bias
    """
    n_pad = adj_i8.shape[0]
    f_in = x.shape[1]
    f_out = w_l.shape[1]

    tm, tk = _pick_tiles(n_pad)
    grid = (n_pad // tm, n_pad // tk)

    # VMEM budget (double-buffered inputs + resident X + scratch), capped at 48 MiB so
    # the same tiling is safe on 64-MiB-VMEM generations.
    bytes_needed = (
        2 * tm * tk * 1            # A tiles (int8, double buffered)
        + 2 * n_pad * f_in * 2     # resident X (bf16; conservatively count 2 buffers)
        + 2 * tm * 4               # inverse-degree tiles
        + 2 * 2 * f_in * f_out * 2  # W_l + W_r (bf16)
        + 2 * f_out * 4            # bias
        + 2 * tm * f_out * 4       # output tiles
        + tm * f_in * 4            # f32 accumulator scratch
    )
    vmem_limit = int(min(48 * 1024 * 1024, max(32 * 1024 * 1024, 2 * bytes_needed)))

    return pl.pallas_call(
        _sage_layer_kernel,
        out_shape=jax.ShapeDtypeStruct((n_pad, f_out), out_dtype),
        grid_spec=pltpu.PrefetchScalarGridSpec(
            num_scalar_prefetch=0,
            grid=grid,
            in_specs=[
                pl.BlockSpec((tm, tk), lambda i, k: (i, k)),        # A tile (int8)
                pl.BlockSpec((n_pad, f_in), lambda i, k: (0, 0)),   # X, VMEM-resident
                pl.BlockSpec((tm, 1), lambda i, k: (i, 0)),         # 1/deg rows
                pl.BlockSpec((f_in, f_out), lambda i, k: (0, 0)),   # W_l
                pl.BlockSpec((f_in, f_out), lambda i, k: (0, 0)),   # W_r
                pl.BlockSpec((1, f_out), lambda i, k: (0, 0)),      # bias
            ],
            out_specs=pl.BlockSpec((tm, f_out), lambda i, k: (i, 0)),
            scratch_shapes=[pltpu.VMEM((tm, f_in), jnp.float32)],   # agg accumulator
        ),
        compiler_params=pltpu.CompilerParams(
            dimension_semantics=("parallel", "arbitrary"),
            vmem_limit_bytes=vmem_limit,
        ),
    )(adj_i8, x, inv_deg, w_l, w_r, b2d)


def build_adj(edge_index, n_pad):
    """Dense 0/1 (with multiplicity) int8 adjacency + f32 inverse in-degree vector.

    A[i, j] = #edges j -> i, so A @ X sums incoming messages; multiplying by
    1/in-degree in the kernel epilogue gives PyG scatter-mean semantics.
    """
    src = edge_index[0]
    dst = edge_index[1]
    counts = jnp.zeros((n_pad, n_pad), jnp.int32).at[dst, src].add(1)
    counts = jnp.minimum(counts, 127).astype(jnp.int8)      # 0/1 (duplicates capped at 127)
    deg = jnp.zeros((n_pad,), jnp.float32).at[dst].add(1.0)
    inv_deg = jnp.where(deg > 0.0, 1.0 / jnp.maximum(deg, 1.0), 0.0)
    return counts, inv_deg.reshape(n_pad, 1)


def init_gnn_params(key, num_features, hidden_dim, out_dim):
    dims = [(num_features, hidden_dim),
            (hidden_dim, hidden_dim),
            (hidden_dim, out_dim)]
    params = []
    for (fin, fout) in dims:
        key, k1, k2, k3 = jax.random.split(key, 4)
        scale = 1.0 / jnp.sqrt(jnp.float32(fin))
        w_l = jax.random.uniform(k1, (fin, fout), jnp.float32, -scale, scale)
        w_r = jax.random.uniform(k2, (fin, fout), jnp.float32, -scale, scale)
        b = jax.random.uniform(k3, (fout,), jnp.float32, -scale, scale)
        params.append((w_l, w_r, b))
    return params


def gnn_forward(params, x, edge_index):
    n, f0 = x.shape
    # Pad nodes to a multiple of 128 (lane-dense adjacency, minimal wasted A traffic).
    n_pad = max(128, _round_up(n, 128))

    # Adjacency (int8 counts) + inverse degree built once, reused by all three layers.
    adj, inv_deg = build_adj(edge_index, n_pad)

    f0_pad = _round_up(f0, 128)
    h = jnp.zeros((n_pad, f0_pad), jnp.bfloat16).at[:n, :f0].set(
        x.astype(jnp.bfloat16))

    num_layers = len(params)
    for li, (w_l, w_r, b) in enumerate(params):
        fin, fout = w_l.shape
        fin_p = _round_up(fin, 128)
        fout_p = _round_up(fout, 128)

        wl = jnp.zeros((fin_p, fout_p), jnp.bfloat16).at[:fin, :fout].set(
            w_l.astype(jnp.bfloat16))
        wr = jnp.zeros((fin_p, fout_p), jnp.bfloat16).at[:fin, :fout].set(
            w_r.astype(jnp.bfloat16))
        b2d = jnp.zeros((1, fout_p), jnp.float32).at[0, :fout].set(b)

        last = (li == num_layers - 1)
        out_dtype = jnp.float32 if last else jnp.bfloat16
        h = sage_layer(adj, h, inv_deg, wl, wr, b2d, out_dtype=out_dtype)

    return h[:n, :params[-1][0].shape[1]]


if __name__ == "__main__":
    num_nodes = 16
    num_features = 8
    hidden_dim = 32
    out_dim = 16
    num_edges = 40

    key = jax.random.PRNGKey(0)
    k_x, k_src, k_dst, k_params = jax.random.split(key, 4)

    x = jax.random.normal(k_x, (num_nodes, num_features), jnp.float32)
    src = jax.random.randint(k_src, (num_edges,), 0, num_nodes, jnp.int32)
    dst = jax.random.randint(k_dst, (num_edges,), 0, num_nodes, jnp.int32)
    edge_index = jnp.stack([src, dst], axis=0)  # [2, E], row0=src, row1=dst

    params = init_gnn_params(k_params, num_features, hidden_dim, out_dim)

    out = jax.jit(gnn_forward)(params, x, edge_index)
    jax.block_until_ready(out)
    assert out.shape == (num_nodes, out_dim)
    assert out.dtype == jnp.float32
    print("KERNEL_OK")
</pallas_src>

<mosaic_0001>
module attributes {stable_mosaic.version = 11 : i64} {
  func.func private @main(%arg0: i32) attributes {dimension_semantics = [#tpu.dimension_semantics<core_parallel>], iteration_bounds = array<i64: 2>, tpu.core_type = #tpu.core_type<sc_scalar_subcore>, window_params = []} {
    return
  }
}

module attributes {stable_mosaic.version = 11 : i64} {
  func.func private @main(%arg0: i32) attributes {dimension_semantics = [#tpu.dimension_semantics<core_parallel>], iteration_bounds = array<i64: 2>, tpu.core_type = #tpu.core_type<sc_scalar_subcore>, window_params = []} {
    return
  }
}

module attributes {stable_mosaic.version = 11 : i64} {
  func.func @_sage_layer_kernel(%arg0: i32, %arg1: i32, %arg2: memref<128x128xi8, #tpu.memory_space<vmem>>, %arg3: memref<128x128xbf16, #tpu.memory_space<vmem>>, %arg4: memref<128x1xf32, #tpu.memory_space<vmem>>, %arg5: memref<128x128xbf16, #tpu.memory_space<vmem>>, %arg6: memref<128x128xbf16, #tpu.memory_space<vmem>>, %arg7: memref<1x128xf32, #tpu.memory_space<vmem>>, %arg8: memref<128x128xf32, #tpu.memory_space<vmem>>, %arg9: memref<128x128xf32, #tpu.memory_space<vmem>>) attributes {dimension_semantics = [#tpu.dimension_semantics<parallel>, #tpu.dimension_semantics<arbitrary>], iteration_bounds = array<i64: 1, 1>, scalar_prefetch = 0 : i64, scratch_operands = 1 : i64, tpu.core_type = #tpu.core_type<tc>, window_params = [{transform_indices = @transform_0, window_bounds = array<i64: 128, 128>}, {pipeline_mode = #tpu.pipeline_mode<synchronous>, transform_indices = @transform_1, window_bounds = array<i64: 128, 128>}, {transform_indices = @transform_2, window_bounds = array<i64: 128, 1>}, {pipeline_mode = #tpu.pipeline_mode<synchronous>, transform_indices = @transform_3, window_bounds = array<i64: 128, 128>}, {pipeline_mode = #tpu.pipeline_mode<synchronous>, transform_indices = @transform_4, window_bounds = array<i64: 128, 128>}, {pipeline_mode = #tpu.pipeline_mode<synchronous>, transform_indices = @transform_5, window_bounds = array<i64: 1, 128>}, {transform_indices = @transform_6, window_bounds = array<i64: 128, 128>}]} {
    %c0_i32 = arith.constant 0 : i32
    %0 = arith.cmpi eq, %arg1, %c0_i32 : i32
    %1 = arith.extui %0 : i1 to i32
    %c0_i32_0 = arith.constant 0 : i32
    %2 = arith.cmpi ne, %1, %c0_i32_0 : i32
    scf.if %2 {
      %cst_9 = arith.constant 0.000000e+00 : f32
      %16 = vector.broadcast %cst_9 : f32 to vector<128x128xf32>
      %c0_10 = arith.constant 0 : index
      %c0_11 = arith.constant 0 : index
      %17 = vector.load %arg9[%c0_10, %c0_11] : memref<128x128xf32, #tpu.memory_space<vmem>>, vector<128x128xf32>
      tpu.vector_store %arg9[%c0_10, %c0_11], %16 {strides = array<i32>} : memref<128x128xf32, #tpu.memory_space<vmem>>, vector<128x128xf32>,
    } else {
    }
    %c128_i32 = arith.constant 128 : i32
    %3 = arith.muli %arg1, %c128_i32 : i32
    %4 = tpu.assume_multiple %3, 128 : i32
    %5 = arith.index_cast %4 : i32 to index
    %c0 = arith.constant 0 : index
    %6 = vector.load %arg3[%5, %c0] : memref<128x128xbf16, #tpu.memory_space<vmem>>, vector<128x128xbf16>
    %c0_1 = arith.constant 0 : index
    %c0_2 = arith.constant 0 : index
    %7 = vector.load %arg2[%c0_1, %c0_2] : memref<128x128xi8, #tpu.memory_space<vmem>>, vector<128x128xi8>
    %8 = arith.sitofp %7 : vector<128x128xi8> to vector<128x128xbf16>
    %c0_3 = arith.constant 0 : index
    %c0_4 = arith.constant 0 : index
    %9 = vector.load %arg9[%c0_3, %c0_4] : memref<128x128xf32, #tpu.memory_space<vmem>>, vector<128x128xf32>
    %cst = arith.constant dense<0.000000e+00> : vector<128x128xf32>
    %10 = tpu.matmul %8, %6, %cst {dimension_numbers = #tpu.dot_dimension_numbers<[1], [0], [0], [1], [0, 0, 1, 1], [], []>} : vector<128x128xbf16>, vector<128x128xbf16>, vector<128x128xf32> -> vector<128x128xf32>
    %11 = arith.addf %9, %10 : vector<128x128xf32>
    %c0_5 = arith.constant 0 : index
    %c0_6 = arith.constant 0 : index
    %12 = vector.load %arg9[%c0_5, %c0_6] : memref<128x128xf32, #tpu.memory_space<vmem>>, vector<128x128xf32>
    tpu.vector_store %arg9[%c0_5, %c0_6], %11 {strides = array<i32>} : memref<128x128xf32, #tpu.memory_space<vmem>>, vector<128x128xf32>,
    %c0_i32_7 = arith.constant 0 : i32
    %13 = arith.cmpi eq, %arg1, %c0_i32_7 : i32
    %14 = arith.extui %13 : i1 to i32
    %c0_i32_8 = arith.constant 0 : i32
    %15 = arith.cmpi ne, %14, %c0_i32_8 : i32
    scf.if %15 {
      %c0_9 = arith.constant 0 : index
      %c0_10 = arith.constant 0 : index
      %16 = vector.load %arg9[%c0_9, %c0_10] : memref<128x128xf32, #tpu.memory_space<vmem>>, vector<128x128xf32>
      %c0_11 = arith.constant 0 : index
      %c0_12 = arith.constant 0 : index
      %17 = vector.load %arg4[%c0_11, %c0_12] : memref<128x1xf32, #tpu.memory_space<vmem>>, vector<128x1xf32>
      %18 = vector.broadcast %17 : vector<128x1xf32> to vector<128x128xf32>
      %19 = arith.mulf %16, %18 : vector<128x128xf32>
      %20 = arith.truncf %19 : vector<128x128xf32> to vector<128x128xbf16>
      %c128_i32_13 = arith.constant 128 : i32
      %21 = arith.muli %arg0, %c128_i32_13 : i32
      %22 = tpu.assume_multiple %21, 128 : i32
      %23 = arith.index_cast %22 : i32 to index
      %c0_14 = arith.constant 0 : index
      %24 = vector.load %arg3[%23, %c0_14] : memref<128x128xbf16, #tpu.memory_space<vmem>>, vector<128x128xbf16>
      %c0_15 = arith.constant 0 : index
      %c0_16 = arith.constant 0 : index
      %25 = vector.load %arg5[%c0_15, %c0_16] : memref<128x128xbf16, #tpu.memory_space<vmem>>, vector<128x128xbf16>
      %cst_17 = arith.constant dense<0.000000e+00> : vector<128x128xf32>
      %26 = tpu.matmul %20, %25, %cst_17 {dimension_numbers = #tpu.dot_dimension_numbers<[1], [0], [0], [1], [0, 0, 1, 1], [], []>} : vector<128x128xbf16>, vector<128x128xbf16>, vector<128x128xf32> -> vector<128x128xf32>
      %c0_18 = arith.constant 0 : index
      %c0_19 = arith.constant 0 : index
      %27 = vector.load %arg6[%c0_18, %c0_19] : memref<128x128xbf16, #tpu.memory_space<vmem>>, vector<128x128xbf16>
      %cst_20 = arith.constant dense<0.000000e+00> : vector<128x128xf32>
      %28 = tpu.matmul %24, %27, %cst_20 {dimension_numbers = #tpu.dot_dimension_numbers<[1], [0], [0], [1], [0, 0, 1, 1], [], []>} : vector<128x128xbf16>, vector<128x128xbf16>, vector<128x128xf32> -> vector<128x128xf32>
      %29 = arith.addf %26, %28 : vector<128x128xf32>
      %c0_21 = arith.constant 0 : index
      %c0_22 = arith.constant 0 : index
      %30 = vector.load %arg7[%c0_21, %c0_22] : memref<1x128xf32, #tpu.memory_space<vmem>>, vector<1x128xf32>
      %31 = vector.broadcast %30 : vector<1x128xf32> to vector<128x128xf32>
      %32 = arith.addf %29, %31 : vector<128x128xf32>
      %cst_23 = arith.constant 0.000000e+00 : f32
      %33 = vector.broadcast %cst_23 : f32 to vector<128x128xf32>
      %34 = arith.maximumf %32, %33 : vector<128x128xf32>
      %c0_24 = arith.constant 0 : index
      %c0_25 = arith.constant 0 : index
      %35 = vector.load %arg8[%c0_24, %c0_25] : memref<128x128xf32, #tpu.memory_space<vmem>>, vector<128x128xf32>
      tpu.vector_store %arg8[%c0_24, %c0_25], %34 {strides = array<i32>} : memref<128x128xf32, #tpu.memory_space<vmem>>, vector<128x128xf32>,
    } else {
    }
    return
  }
  func.func @transform_0(%arg0: i32, %arg1: i32) -> (i32, i32) {
    %c0_i32 = arith.constant 0 : i32
    return %arg0, %arg1 : i32, i32
  }
  func.func @transform_1(%arg0: i32, %arg1: i32) -> (i32, i32) {
    %c0_i32 = arith.constant 0 : i32
    %c0_i32_0 = arith.constant 0 : i32
    %c0_i32_1 = arith.constant 0 : i32
    return %c0_i32, %c0_i32_0 : i32, i32
  }
  func.func @transform_2(%arg0: i32, %arg1: i32) -> (i32, i32) {
    %c0_i32 = arith.constant 0 : i32
    %c0_i32_0 = arith.constant 0 : i32
    return %arg0, %c0_i32 : i32, i32
  }
  func.func @transform_3(%arg0: i32, %arg1: i32) -> (i32, i32) {
    %c0_i32 = arith.constant 0 : i32
    %c0_i32_0 = arith.constant 0 : i32
    %c0_i32_1 = arith.constant 0 : i32
    return %c0_i32, %c0_i32_0 : i32, i32
  }
  func.func @transform_4(%arg0: i32, %arg1: i32) -> (i32, i32) {
    %c0_i32 = arith.constant 0 : i32
    %c0_i32_0 = arith.constant 0 : i32
    %c0_i32_1 = arith.constant 0 : i32
    return %c0_i32, %c0_i32_0 : i32, i32
  }
  func.func @transform_5(%arg0: i32, %arg1: i32) -> (i32, i32) {
    %c0_i32 = arith.constant 0 : i32
    %c0_i32_0 = arith.constant 0 : i32
    %c0_i32_1 = arith.constant 0 : i32
    return %c0_i32, %c0_i32_0 : i32, i32
  }
  func.func @transform_6(%arg0: i32, %arg1: i32) -> (i32, i32) {
    %c0_i32 = arith.constant 0 : i32
    %c0_i32_0 = arith.constant 0 : i32
    return %arg0, %c0_i32 : i32, i32
  }
}

module attributes {stable_mosaic.version = 11 : i64} {
  func.func @_sage_layer_kernel(%arg0: i32, %arg1: i32, %arg2: memref<128x128xi8, #tpu.memory_space<vmem>>, %arg3: memref<128x128xbf16, #tpu.memory_space<vmem>>, %arg4: memref<128x1xf32, #tpu.memory_space<vmem>>, %arg5: memref<128x128xbf16, #tpu.memory_space<vmem>>, %arg6: memref<128x128xbf16, #tpu.memory_space<vmem>>, %arg7: memref<1x128xf32, #tpu.memory_space<vmem>>, %arg8: memref<128x128xbf16, #tpu.memory_space<vmem>>, %arg9: memref<128x128xf32, #tpu.memory_space<vmem>>) attributes {dimension_semantics = [#tpu.dimension_semantics<parallel>, #tpu.dimension_semantics<arbitrary>], iteration_bounds = array<i64: 1, 1>, scalar_prefetch = 0 : i64, scratch_operands = 1 : i64, tpu.core_type = #tpu.core_type<tc>, window_params = [{transform_indices = @transform_0, window_bounds = array<i64: 128, 128>}, {pipeline_mode = #tpu.pipeline_mode<synchronous>, transform_indices = @transform_1, window_bounds = array<i64: 128, 128>}, {transform_indices = @transform_2, window_bounds = array<i64: 128, 1>}, {pipeline_mode = #tpu.pipeline_mode<synchronous>, transform_indices = @transform_3, window_bounds = array<i64: 128, 128>}, {pipeline_mode = #tpu.pipeline_mode<synchronous>, transform_indices = @transform_4, window_bounds = array<i64: 128, 128>}, {pipeline_mode = #tpu.pipeline_mode<synchronous>, transform_indices = @transform_5, window_bounds = array<i64: 1, 128>}, {transform_indices = @transform_6, window_bounds = array<i64: 128, 128>}]} {
    %c0_i32 = arith.constant 0 : i32
    %0 = arith.cmpi eq, %arg1, %c0_i32 : i32
    %1 = arith.extui %0 : i1 to i32
    %c0_i32_0 = arith.constant 0 : i32
    %2 = arith.cmpi ne, %1, %c0_i32_0 : i32
    scf.if %2 {
      %cst_9 = arith.constant 0.000000e+00 : f32
      %16 = vector.broadcast %cst_9 : f32 to vector<128x128xf32>
      %c0_10 = arith.constant 0 : index
      %c0_11 = arith.constant 0 : index
      %17 = vector.load %arg9[%c0_10, %c0_11] : memref<128x128xf32, #tpu.memory_space<vmem>>, vector<128x128xf32>
      tpu.vector_store %arg9[%c0_10, %c0_11], %16 {strides = array<i32>} : memref<128x128xf32, #tpu.memory_space<vmem>>, vector<128x128xf32>,
    } else {
    }
    %c128_i32 = arith.constant 128 : i32
    %3 = arith.muli %arg1, %c128_i32 : i32
    %4 = tpu.assume_multiple %3, 128 : i32
    %5 = arith.index_cast %4 : i32 to index
    %c0 = arith.constant 0 : index
    %6 = vector.load %arg3[%5, %c0] : memref<128x128xbf16, #tpu.memory_space<vmem>>, vector<128x128xbf16>
    %c0_1 = arith.constant 0 : index
    %c0_2 = arith.constant 0 : index
    %7 = vector.load %arg2[%c0_1, %c0_2] : memref<128x128xi8, #tpu.memory_space<vmem>>, vector<128x128xi8>
    %8 = arith.sitofp %7 : vector<128x128xi8> to vector<128x128xbf16>
    %c0_3 = arith.constant 0 : index
    %c0_4 = arith.constant 0 : index
    %9 = vector.load %arg9[%c0_3, %c0_4] : memref<128x128xf32, #tpu.memory_space<vmem>>, vector<128x128xf32>
    %cst = arith.constant dense<0.000000e+00> : vector<128x128xf32>
    %10 = tpu.matmul %8, %6, %cst {dimension_numbers = #tpu.dot_dimension_numbers<[1], [0], [0], [1], [0, 0, 1, 1], [], []>} : vector<128x128xbf16>, vector<128x128xbf16>, vector<128x128xf32> -> vector<128x128xf32>
    %11 = arith.addf %9, %10 : vector<128x128xf32>
    %c0_5 = arith.constant 0 : index
    %c0_6 = arith.constant 0 : index
    %12 = vector.load %arg9[%c0_5, %c0_6] : memref<128x128xf32, #tpu.memory_space<vmem>>, vector<128x128xf32>
    tpu.vector_store %arg9[%c0_5, %c0_6], %11 {strides = array<i32>} : memref<128x128xf32, #tpu.memory_space<vmem>>, vector<128x128xf32>,
    %c0_i32_7 = arith.constant 0 : i32
    %13 = arith.cmpi eq, %arg1, %c0_i32_7 : i32
    %14 = arith.extui %13 : i1 to i32
    %c0_i32_8 = arith.constant 0 : i32
    %15 = arith.cmpi ne, %14, %c0_i32_8 : i32
    scf.if %15 {
      %c0_9 = arith.constant 0 : index
      %c0_10 = arith.constant 0 : index
      %16 = vector.load %arg9[%c0_9, %c0_10] : memref<128x128xf32, #tpu.memory_space<vmem>>, vector<128x128xf32>
      %c0_11 = arith.constant 0 : index
      %c0_12 = arith.constant 0 : index
      %17 = vector.load %arg4[%c0_11, %c0_12] : memref<128x1xf32, #tpu.memory_space<vmem>>, vector<128x1xf32>
      %18 = vector.broadcast %17 : vector<128x1xf32> to vector<128x128xf32>
      %19 = arith.mulf %16, %18 : vector<128x128xf32>
      %20 = arith.truncf %19 : vector<128x128xf32> to vector<128x128xbf16>
      %c128_i32_13 = arith.constant 128 : i32
      %21 = arith.muli %arg0, %c128_i32_13 : i32
      %22 = tpu.assume_multiple %21, 128 : i32
      %23 = arith.index_cast %22 : i32 to index
      %c0_14 = arith.constant 0 : index
      %24 = vector.load %arg3[%23, %c0_14] : memref<128x128xbf16, #tpu.memory_space<vmem>>, vector<128x128xbf16>
      %c0_15 = arith.constant 0 : index
      %c0_16 = arith.constant 0 : index
      %25 = vector.load %arg5[%c0_15, %c0_16] : memref<128x128xbf16, #tpu.memory_space<vmem>>, vector<128x128xbf16>
      %cst_17 = arith.constant dense<0.000000e+00> : vector<128x128xf32>
      %26 = tpu.matmul %20, %25, %cst_17 {dimension_numbers = #tpu.dot_dimension_numbers<[1], [0], [0], [1], [0, 0, 1, 1], [], []>} : vector<128x128xbf16>, vector<128x128xbf16>, vector<128x128xf32> -> vector<128x128xf32>
      %c0_18 = arith.constant 0 : index
      %c0_19 = arith.constant 0 : index
      %27 = vector.load %arg6[%c0_18, %c0_19] : memref<128x128xbf16, #tpu.memory_space<vmem>>, vector<128x128xbf16>
      %cst_20 = arith.constant dense<0.000000e+00> : vector<128x128xf32>
      %28 = tpu.matmul %24, %27, %cst_20 {dimension_numbers = #tpu.dot_dimension_numbers<[1], [0], [0], [1], [0, 0, 1, 1], [], []>} : vector<128x128xbf16>, vector<128x128xbf16>, vector<128x128xf32> -> vector<128x128xf32>
      %29 = arith.addf %26, %28 : vector<128x128xf32>
      %c0_21 = arith.constant 0 : index
      %c0_22 = arith.constant 0 : index
      %30 = vector.load %arg7[%c0_21, %c0_22] : memref<1x128xf32, #tpu.memory_space<vmem>>, vector<1x128xf32>
      %31 = vector.broadcast %30 : vector<1x128xf32> to vector<128x128xf32>
      %32 = arith.addf %29, %31 : vector<128x128xf32>
      %cst_23 = arith.constant 0.000000e+00 : f32
      %33 = vector.broadcast %cst_23 : f32 to vector<128x128xf32>
      %34 = arith.maximumf %32, %33 : vector<128x128xf32>
      %35 = arith.truncf %34 : vector<128x128xf32> to vector<128x128xbf16>
      %c0_24 = arith.constant 0 : index
      %c0_25 = arith.constant 0 : index
      %36 = vector.load %arg8[%c0_24, %c0_25] : memref<128x128xbf16, #tpu.memory_space<vmem>>, vector<128x128xbf16>
      tpu.vector_store %arg8[%c0_24, %c0_25], %35 {strides = array<i32>} : memref<128x128xbf16, #tpu.memory_space<vmem>>, vector<128x128xbf16>,
    } else {
    }
    return
  }
  func.func @transform_0(%arg0: i32, %arg1: i32) -> (i32, i32) {
    %c0_i32 = arith.constant 0 : i32
    return %arg0, %arg1 : i32, i32
  }
  func.func @transform_1(%arg0: i32, %arg1: i32) -> (i32, i32) {
    %c0_i32 = arith.constant 0 : i32
    %c0_i32_0 = arith.constant 0 : i32
    %c0_i32_1 = arith.constant 0 : i32
    return %c0_i32, %c0_i32_0 : i32, i32
  }
  func.func @transform_2(%arg0: i32, %arg1: i32) -> (i32, i32) {
    %c0_i32 = arith.constant 0 : i32
    %c0_i32_0 = arith.constant 0 : i32
    return %arg0, %c0_i32 : i32, i32
  }
  func.func @transform_3(%arg0: i32, %arg1: i32) -> (i32, i32) {
    %c0_i32 = arith.constant 0 : i32
    %c0_i32_0 = arith.constant 0 : i32
    %c0_i32_1 = arith.constant 0 : i32
    return %c0_i32, %c0_i32_0 : i32, i32
  }
  func.func @transform_4(%arg0: i32, %arg1: i32) -> (i32, i32) {
    %c0_i32 = arith.constant 0 : i32
    %c0_i32_0 = arith.constant 0 : i32
    %c0_i32_1 = arith.constant 0 : i32
    return %c0_i32, %c0_i32_0 : i32, i32
  }
  func.func @transform_5(%arg0: i32, %arg1: i32) -> (i32, i32) {
    %c0_i32 = arith.constant 0 : i32
    %c0_i32_0 = arith.constant 0 : i32
    %c0_i32_1 = arith.constant 0 : i32
    return %c0_i32, %c0_i32_0 : i32, i32
  }
  func.func @transform_6(%arg0: i32, %arg1: i32) -> (i32, i32) {
    %c0_i32 = arith.constant 0 : i32
    %c0_i32_0 = arith.constant 0 : i32
    return %arg0, %c0_i32 : i32, i32
  }
}

</mosaic_0001>

<bundles_post_ra>
// kernel: gnn_forward.3
= control target key start
LH: loop header
LB: loop body
LE: loop exit
PB: predicated region body
PF: predicated region fallthrough
CT: control target
= control target key end

     0   :  { %v1234_v1 = vmov 0   ;;  %s1475_s1 = inlined_call_operand.vmem [shape: bf16[128,128], index: 1, kind: input, shape index: {}]   ;;  %s1476_s0 = inlined_call_operand.vmem [shape: s8[128,128], index: 0, kind: input, shape index: {}]   ;;  %s1477_s2 = inlined_call_operand.vmem [shape: f32[128,1], index: 2, kind: input, shape index: {}]   ;;  %s1478_s4 = inlined_call_operand.vmem [shape: bf16[128,128], index: 4, kind: input, shape index: {}]   ;;  %s1479_s3 = inlined_call_operand.vmem [shape: bf16[128,128], index: 3, kind: input, shape index: {}]   ;;  %s1480_s5 = inlined_call_operand.vmem [shape: f32[1,128], index: 5, kind: input, shape index: {}]   ;;  %s1481_s6 = inlined_call_operand.vmem [shape: bf16[128,128], index: 6, kind: output, shape index: {}]  }
   0x1   :  { %v1202_v0 = vld [vmem:[%s1475_s1 + $0x38] sm:$0xff]   ;;  %1201 = vset.pattern.permute.xlu1 %v1234_v1  ;;  %1200 = vset.pattern.permute.xlu0 %v1234_v1  ;;  %v1203_v2 = vld [vmem:[%s1475_s1 + $0x30] sm:$0xff]   ;;  %v1204_v3 = vld [vmem:[%s1475_s1 + $0x28] sm:$0xff]  }
   0x2   :  { %1087 = vmatprep.subr.bf16.mxu0 %v1202_v0  ;;  %v1205_v4 = vld [vmem:[%s1475_s1 + $0x20] sm:$0xff]   ;;  %v298_v9 = vld [vmem:[%s1477_s2 + $0x48] sm:$0xff]  ;;  %v1206_v11 = vld [vmem:[%s1475_s1 + $0x18] sm:$0xff]  }
   0x3   :  { %1088 = vmatpush3.bf16.msra.mxu0 %v1202_v0  ;;  %v1285_v5 = vld [vmem:[%s1476_s0] sm:$0xff]  ;;  %v290_v10 = vld [vmem:[%s1477_s2 + $0x8] sm:$0xff]  ;;  %v1207_v12 = vld [vmem:[%s1475_s1 + $0x10] sm:$0xff]  }
   0x4   :  { %1089 = vmatprep.subr.bf16.mxu0 %v1203_v2  ;;  %v69_v6 = vunpack.c.l.s8.bf16 %v1285_v5  ;;  %v297_v7 = vld [vmem:[%s1477_s2 + $0x40] sm:$0xff]  ;;  %v292_v13 = vld [vmem:[%s1477_s2 + $0x18] sm:$0xff]  ;;  %v291_v14 = vld [vmem:[%s1477_s2 + $0x10] sm:$0xff]  ;;  %v70_v32 = vunpack.c.h.s8.bf16 %v1285_v5 }
   0x5   :  { %v289_v8 = vld [vmem:[%s1477_s2] sm:$0xff]  ;;  %347 = vperm.xlu1 %1201, %v297_v7   ;;  %v1210_v15 = vld [vmem:[%s1478_s4 + $0x38] sm:$0xff]   ;;  %v1211_v16 = vld [vmem:[%s1478_s4 + $0x30] sm:$0xff]  }
   0x6   :  { %307 = vperm.xlu0 %1200, %v289_v8   ;;  %1103 = vmatprep.mubr.bf16.mxu0 %v69_v6  ;;  %v1208_v17 = vld [vmem:[%s1475_s1 + $0x8] sm:$0xff]   ;;  %v300_v18 = vld [vmem:[%s1477_s2 + $0x58] sm:$0xff]  ;;  %v299_v19 = vld [vmem:[%s1477_s2 + $0x50] sm:$0xff] }
   0x7   :  { %1090 = vmatpush3.bf16.msra.mxu0 %v1203_v2  ;;  %1119 = vmatprep.subr.bf16.mxu1 %v1210_v15  ;;  %v1212_v20 = vld [vmem:[%s1478_s4 + $0x28] sm:$0xff]   ;;  %v1209_v21 = vld [vmem:[%s1475_s1] sm:$0xff]   ;;  %v1214_v29 = vld [vmem:[%s1478_s4 + $0x18] sm:$0xff]  }
   0x8   :  { %1091 = vmatprep.subr.bf16.mxu0 %v1204_v3  ;;  %1120 = vmatpush3.bf16.msra.mxu1 %v1210_v15  ;;  %v294_v22 = vld [vmem:[%s1477_s2 + $0x28] sm:$0xff]  ;;  %v293_v23 = vld [vmem:[%s1477_s2 + $0x20] sm:$0xff]  ;;  %v1216_v30 = vld [vmem:[%s1479_s3 + $0x38] sm:$0xff]  }
   0x9   :  { %352 = vperm.xlu1 %1201, %v298_v9   ;;  %1121 = vmatprep.subr.bf16.mxu1 %v1211_v16  ;;  %v1213_v24 = vld [vmem:[%s1478_s4 + $0x20] sm:$0xff]   ;;  %v302_v25 = vld [vmem:[%s1477_s2 + $0x68] sm:$0xff]  ;;  %v296_v31 = vld [vmem:[%s1477_s2 + $0x38] sm:$0xff] }
   0xa   :  { %312 = vperm.xlu0 %1200, %v290_v10   ;;  %v301_v26 = vld [vmem:[%s1477_s2 + $0x60] sm:$0xff]  ;;  %v66_v27 = vld [vmem:[%s1476_s0 + $0x8] sm:$0xff]  ;;  %v295_v33 = vld [vmem:[%s1477_s2 + $0x30] sm:$0xff] }
   0xb   :  { %1092 = vmatpush3.bf16.msra.mxu0 %v1204_v3  ;;  %v1221_v28 = vld [vmem:[%s1475_s1] sm:$0xff]   ;;  %v71_v34 = vunpack.c.l.s8.bf16 %v66_v27  ;;  %v1215_v35 = vld [vmem:[%s1478_s4 + $0x10] sm:$0xff]   ;;  %v304_v37 = vld [vmem:[%s1477_s2 + $0x78] sm:$0xff]  ;;  %v72_v42 = vunpack.c.h.s8.bf16 %v66_v27 }
   0xc   :  { %1093 = vmatprep.subr.bf16.mxu0 %v1205_v4  ;;  %1122 = vmatpush3.bf16.msra.mxu1 %v1211_v16  ;;  %v1218_v36 = vld [vmem:[%s1479_s3 + $0x30] sm:$0xff]   ;;  %v1217_v40 = vld [vmem:[%s1478_s4 + $0x8] sm:$0xff]   ;;  %v1219_v44 = vld [vmem:[%s1478_s4] sm:$0xff]  }
   0xd   :  { %322 = vperm.xlu1 %1201, %v292_v13   ;;  %1123 = vmatprep.subr.bf16.mxu1 %v1212_v20  ;;  %v67_v38 = vld [vmem:[%s1476_s0 + $0x10] sm:$0xff]  ;;  %v1220_v41 = vld [vmem:[%s1479_s3 + $0x28] sm:$0xff]   ;;  %v1223_v45 = vld [vmem:[%s1479_s3 + $0x20] sm:$0xff]  }
   0xe   :  { %317 = vperm.xlu0 %1200, %v291_v14   ;;  %1135 = vmatprep.mubr.bf16.mxu1 %v1221_v28  ;;  %v303_v39 = vld [vmem:[%s1477_s2 + $0x70] sm:$0xff]  ;;  %v73_v43 = vunpack.c.l.s8.bf16 %v67_v38  ;;  %v68_v46 = vld [vmem:[%s1476_s0 + $0x18] sm:$0xff]  ;;  %v74_v48 = vunpack.c.h.s8.bf16 %v67_v38  ;;  %v1222_v50 = vld [vmem:[%s1475_s1 + $0x8] sm:$0xff]  }
   0xf   :  { %1094 = vmatpush3.bf16.msra.mxu0 %v1205_v4  ;;  %v1224_v47 = vld [vmem:[%s1479_s3 + $0x18] sm:$0xff]   ;;  %v75_v49 = vunpack.c.l.s8.bf16 %v68_v46  ;;  %v1225_v51 = vld [vmem:[%s1475_s1 + $0x10] sm:$0xff]   ;;  %v76_v52 = vunpack.c.h.s8.bf16 %v68_v46  ;;  %v1228_v55 = vld [vmem:[%s1479_s3 + $0x8] sm:$0xff]  }
  0x10   :  { %1095 = vmatprep.subr.bf16.mxu0 %v1206_v11  ;;  %1124 = vmatpush3.bf16.msra.mxu1 %v1212_v20  ;;  %v1226_v53 = vld [vmem:[%s1475_s1 + $0x18] sm:$0xff]   ;;  %v1227_v54 = vld [vmem:[%s1479_s3 + $0x10] sm:$0xff]   ;;  %v1229_v56 = vld [vmem:[%s1475_s1 + $0x20] sm:$0xff]  }
  0x11   :  { %362 = vperm.xlu1 %1201, %v300_v18   ;;  %1125 = vmatprep.subr.bf16.mxu1 %v1213_v24  ;;  %v1230_v57 = vld [vmem:[%s1475_s1 + $0x28] sm:$0xff]   ;;  %v1231_v58 = vld [vmem:[%s1479_s3] sm:$0xff]   ;;  %v1232_v59 = vld [vmem:[%s1475_s1 + $0x30] sm:$0xff]  }
  0x12   :  { %357 = vperm.xlu0 %1200, %v299_v19   ;;  %v1233_v60 = vld [vmem:[%s1475_s1 + $0x38] sm:$0xff]  }
  0x13   :  { %1096 = vmatpush3.bf16.msra.mxu0 %v1206_v11 }
  0x14   :  { %1097 = vmatprep.subr.bf16.mxu0 %v1207_v12  ;;  %1126 = vmatpush3.bf16.msra.mxu1 %v1213_v24 }
  0x15   :  { %332 = vperm.xlu1 %1201, %v294_v22   ;;  %1127 = vmatprep.subr.bf16.mxu1 %v1214_v29 }
  0x16   :  { %327 = vperm.xlu0 %1200, %v293_v23  }
  0x17   :  { %1098 = vmatpush3.bf16.msra.mxu0 %v1207_v12 }
  0x18   :  { %1099 = vmatprep.subr.bf16.mxu0 %v1208_v17  ;;  %1128 = vmatpush3.bf16.msra.mxu1 %v1214_v29 }
  0x19   :  { %372 = vperm.xlu1 %1201, %v302_v25   ;;  %1129 = vmatprep.subr.bf16.mxu1 %v1215_v35 }
  0x1a   :  { %367 = vperm.xlu0 %1200, %v301_v26  }
  0x1b   :  { %1100 = vmatpush3.bf16.msra.mxu0 %v1208_v17 }
  0x1c   :  { %1101 = vmatprep.subr.bf16.mxu0 %v1209_v21  ;;  %1130 = vmatpush3.bf16.msra.mxu1 %v1215_v35 }
  0x1d   :  { %342 = vperm.xlu1 %1201, %v296_v31   ;;  %1131 = vmatprep.subr.bf16.mxu1 %v1217_v40 }
  0x1e   :  { %337 = vperm.xlu0 %1200, %v295_v33  }
  0x1f   :  { %1102 = vmatpush3.bf16.msra.mxu0 %v1209_v21 }
  0x20   :  { %1151 = vmatprep.subr.bf16.mxu0 %v1216_v30  ;;  %1132 = vmatpush3.bf16.msra.mxu1 %v1217_v40 }
  0x21   :  { %382 = vperm.xlu1 %1201, %v304_v37   ;;  %1133 = vmatprep.subr.bf16.mxu1 %v1219_v44 }
  0x22   :  { %1104 = vmatmul.mubr.bf16.vlgmr.msra.gmra.mxu0 %v70_v32  ;;  %377 = vperm.xlu0 %1200, %v303_v39  }
  0x23   :  { %1107 = vmatprep.mubr.bf16.mxu0 %v71_v34  ;;  %1152 = vmatpush3.bf16.msra.mxu0 %v1216_v30 }
  0x24   :  { %1153 = vmatprep.subr.bf16.mxu0 %v1218_v36  ;;  %1134 = vmatpush3.bf16.msra.mxu1 %v1219_v44 }
  0x25   :  { %1183 = vmatprep.subr.bf16.mxu1 %v1216_v30 }
  0x27   :  { %1154 = vmatpush3.bf16.msra.mxu0 %v1218_v36  ;;  %1136 = vmatmul.mubr.bf16.vlgmr.msra.gmra.mxu1 %v1222_v50 }
  0x28   :  { %1155 = vmatprep.subr.bf16.mxu0 %v1220_v41  ;;  %1191 = vmatpush3.bf16.msra.mxu1 %v1216_v30 }
  0x29   :  { %1139 = vmatprep.mubr.bf16.mxu1 %v1225_v51  ;;  %1184 = vmatprep.subr.bf16.mxu1 %v1218_v36 }
  0x2a   :  { %1108 = vmatmul.mubr.bf16.gmra.mxu0 %v72_v42 }
  0x2b   :  { %1111 = vmatprep.mubr.bf16.mxu0 %v73_v43  ;;  %1156 = vmatpush3.bf16.msra.mxu0 %v1220_v41 }
  0x2c   :  { %1157 = vmatprep.subr.bf16.mxu0 %v1223_v45  ;;  %1192 = vmatpush3.bf16.msra.mxu1 %v1218_v36 }
  0x2d   :  { %1185 = vmatprep.subr.bf16.mxu1 %v1220_v41 }
  0x2f   :  { %1158 = vmatpush3.bf16.msra.mxu0 %v1223_v45  ;;  %1140 = vmatmul.mubr.bf16.gmra.mxu1 %v1226_v53 }
  0x30   :  { %1159 = vmatprep.subr.bf16.mxu0 %v1224_v47  ;;  %1193 = vmatpush3.bf16.msra.mxu1 %v1220_v41 }
  0x31   :  { %1186 = vmatprep.subr.bf16.mxu1 %v1223_v45  ;;  %1143 = vmatprep.mubr.bf16.mxu1 %v1229_v56 }
  0x32   :  { %1112 = vmatmul.mubr.bf16.gmra.mxu0 %v74_v48 }
  0x33   :  { %1115 = vmatprep.mubr.bf16.mxu0 %v75_v49  ;;  %1160 = vmatpush3.bf16.msra.mxu0 %v1224_v47 }
  0x34   :  { %1194 = vmatpush3.bf16.msra.mxu1 %v1223_v45  ;;  %1161 = vmatprep.subr.bf16.mxu0 %v1227_v54 }
  0x35   :  { %1187 = vmatprep.subr.bf16.mxu1 %v1224_v47 }
  0x37   :  { %1162 = vmatpush3.bf16.msra.mxu0 %v1227_v54  ;;  %1144 = vmatmul.mubr.bf16.gmra.mxu1 %v1230_v57 }
  0x38   :  { %1195 = vmatpush3.bf16.msra.mxu1 %v1224_v47  ;;  %1163 = vmatprep.subr.bf16.mxu0 %v1228_v55 }
  0x39   :  { %1188 = vmatprep.subr.bf16.mxu1 %v1227_v54  ;;  %1147 = vmatprep.mubr.bf16.mxu1 %v1232_v59 }
  0x3a   :  { %1116 = vmatmul.mubr.bf16.gmra.mxu0 %v76_v52 }
  0x3b   :  { %1164 = vmatpush3.bf16.msra.mxu0 %v1228_v55 }
  0x3c   :  { %1196 = vmatpush3.bf16.msra.mxu1 %v1227_v54  ;;  %1165 = vmatprep.subr.bf16.mxu0 %v1231_v58 }
  0x3d   :  { %1189 = vmatprep.subr.bf16.mxu1 %v1228_v55 }
  0x3f   :  { %1166 = vmatpush3.bf16.msra.mxu0 %v1231_v58  ;;  %1148 = vmatmul.mubr.bf16.gmra.mxu1 %v1233_v60 }
  0x40   :  { %1197 = vmatpush3.bf16.msra.mxu1 %v1228_v55 }
  0x41   :  { %1190 = vmatprep.subr.bf16.mxu1 %v1231_v58 }
  0x44   :  { %1198 = vmatpush3.bf16.msra.mxu1 %v1231_v58 }
  0x80   :  { %v348_v61 = vpop.permute.xlu1 %347 }
  0x81   :  { %v308_v62 = vpop.permute.xlu0 %307 }
  0x84   :  { %v353_v63 = vpop.permute.xlu1 %352 }
  0x85   :  { %v313_v0 = vpop.permute.xlu0 %312 }
  0x88   :  { %v323_v1 = vpop.permute.xlu1 %322 }
  0x89   :  { %v318_v2 = vpop.permute.xlu0 %317 }
  0x8c   :  { %v363_v3 = vpop.permute.xlu1 %362 }
  0x8d   :  { %v358_v4 = vpop.permute.xlu0 %357 }
  0x90   :  { %v333_v6 = vpop.permute.xlu1 %332 }
  0x91   :  { %v328_v8 = vpop.permute.xlu0 %327 }
  0x94   :  { %v373_v12 = vpop.permute.xlu1 %372 }
  0x95   :  { %v368_v17 = vpop.permute.xlu0 %367 }
  0x98   :  { %v343_v22 = vpop.permute.xlu1 %342 }
  0x99   :  { %v338_v25 = vpop.permute.xlu0 %337 }
  0x9c   :  { %v383_v44 = vpop.permute.xlu1 %382 }
  0x9d   :  { %v378_v47 = vpop.permute.xlu0 %377 }
  0xe2   :  { %v1105_v5 = vpop.f32.mrf.mxu0 }
  0xe3   :  { %v387_v15 = vmul.f32 %v1105_v5, %v318_v2 }
  0xe4   :  { %v175_v7 = vpop.f32.mrf.mxu0 }
  0xe5   :  { %v385_v13 = vmul.f32 %v308_v62, %v175_v7 }
  0xe6   :  { %v1106_v9 = vpop.f32.mrf.mxu0 }
  0xe7   :  { %v388_v10 = vmul.f32 %v1106_v9, %v323_v1  ;;  %v1137_v53 = vpop.f32.mrf.mxu1 }
  0xe8   :  { %v178_v11 = vpop.f32.mrf.mxu0 }
  0xe9   :  { %v386_v14 = vmul.f32 %v313_v0, %v178_v11  ;;  %v402_v19 = vpack.c.bf16 %v388_v10, %v387_v15  ;;  %v592_v54 = vpop.f32.mrf.mxu1 }
  0xea   :  { %v1109_v16 = vpop.f32.mrf.mxu0 }
  0xeb   :  { %v401_v18 = vpack.c.bf16 %v386_v14, %v385_v13  ;;  %v391_v28 = vmul.f32 %v1109_v16, %v338_v25  ;;  %v1138_v55 = vpop.f32.mrf.mxu1 }
  0xec   :  { %v191_v20 = vpop.f32.mrf.mxu0 }
  0xed   :  { %1167 = vmatprep.mubr.bf16.mxu0 %v401_v18  ;;  %v389_v26 = vmul.f32 %v328_v8, %v191_v20  ;;  %v595_v56 = vpop.f32.mrf.mxu1 }
  0xee   :  { %v1110_v21 = vpop.f32.mrf.mxu0  ;;  %1168 = vmatmul.mubr.bf16.vlgmr.msra.gmra.mxu0 %v402_v19 }
  0xef   :  { %v392_v23 = vmul.f32 %v1110_v21, %v343_v22  ;;  %v1141_v57 = vpop.f32.mrf.mxu1 }
  0xf0   :  { %v194_v24 = vpop.f32.mrf.mxu0 }
  0xf1   :  { %v390_v27 = vmul.f32 %v333_v6, %v194_v24  ;;  %v404_v31 = vpack.c.bf16 %v392_v23, %v391_v28  ;;  %v608_v58 = vpop.f32.mrf.mxu1 }
  0xf2   :  { %v1113_v29 = vpop.f32.mrf.mxu0 }
  0xf3   :  { %v403_v30 = vpack.c.bf16 %v390_v27, %v389_v26  ;;  %v395_v38 = vmul.f32 %v1113_v29, %v358_v4  ;;  %v1142_v59 = vpop.f32.mrf.mxu1 }
  0xf4   :  { %v207_v32 = vpop.f32.mrf.mxu0 }
  0xf5   :  { %1171 = vmatprep.mubr.bf16.mxu0 %v403_v30  ;;  %v393_v36 = vmul.f32 %v348_v61, %v207_v32  ;;  %v611_v60 = vpop.f32.mrf.mxu1 }
  0xf6   :  { %v1114_v33 = vpop.f32.mrf.mxu0  ;;  %1172 = vmatmul.mubr.bf16.gmra.mxu0 %v404_v31 }
  0xf7   :  { %v396_v34 = vmul.f32 %v1114_v33, %v363_v3  ;;  %v1145_v61 = vpop.f32.mrf.mxu1  ;;  %v1433_v3 = vld [vmem:[%s1480_s5] ss:$0 sm:$0xff] }
  0xf8   :  { %v210_v35 = vpop.f32.mrf.mxu0 }
  0xf9   :  { %v394_v37 = vmul.f32 %v353_v63, %v210_v35  ;;  %v406_v41 = vpack.c.bf16 %v396_v34, %v395_v38  ;;  %v624_v62 = vpop.f32.mrf.mxu1 }
  0xfa   :  { %v1117_v39 = vpop.f32.mrf.mxu0 }
  0xfb   :  { %v405_v40 = vpack.c.bf16 %v394_v37, %v393_v36  ;;  %v399_v50 = vmul.f32 %v1117_v39, %v378_v47  ;;  %v1146_v63 = vpop.f32.mrf.mxu1 }
  0xfc   :  { %v223_v42 = vpop.f32.mrf.mxu0 }
  0xfd   :  { %1175 = vmatprep.mubr.bf16.mxu1 %v405_v40  ;;  %v397_v48 = vmul.f32 %v368_v17, %v223_v42  ;;  %v627_v0 = vpop.f32.mrf.mxu1 }
  0xfe   :  { %v1118_v43 = vpop.f32.mrf.mxu0  ;;  %1176 = vmatmul.mubr.bf16.vlgmr.msra.gmra.mxu1 %v406_v41 }
  0xff   :  { %v400_v45 = vmul.f32 %v1118_v43, %v383_v44  ;;  %v1149_v4 = vpop.f32.mrf.mxu1 }
 0x100   :  { %v226_v46 = vpop.f32.mrf.mxu0 }
 0x101   :  { %v398_v49 = vmul.f32 %v373_v12, %v226_v46  ;;  %v408_v52 = vpack.c.bf16 %v400_v45, %v399_v50  ;;  %v640_v10 = vpop.f32.mrf.mxu1 }
 0x103   :  { %v407_v51 = vpack.c.bf16 %v398_v49, %v397_v48  ;;  %v1150_v20 = vpop.f32.mrf.mxu1 }
 0x105   :  { %1179 = vmatprep.mubr.bf16.mxu1 %v407_v51  ;;  %v643_v30 = vpop.f32.mrf.mxu1 }
 0x106   :  { %1180 = vmatmul.mubr.bf16.gmra.mxu1 %v408_v52 }
 0x1ae   :  { %v1169_v1 = vpop.f32.mrf.mxu0 }
 0x1af   :  { %v746_v2 = vadd.f32 %v1169_v1, %v1137_v53 }
 0x1b0   :  { %v737_v5 = vpop.f32.mrf.mxu0 }
 0x1b1   :  { %v738_v6 = vadd.f32 %v737_v5, %v592_v54  ;;  %v809_v8 = vadd.f32 %v1433_v3, %v746_v2 }
 0x1b2   :  { %v1170_v7 = vpop.f32.mrf.mxu0 }
 0x1b3   :  { %v749_v9 = vadd.f32 %v1170_v7, %v1138_v55  ;;  %v807_v12 = vadd.f32 %v1433_v3, %v738_v6  ;;  %v825_v16 = vmax.f32 %v809_v8, 0.0 }
 0x1b4   :  { %v740_v11 = vpop.f32.mrf.mxu0 }
 0x1b5   :  { %v810_v13 = vadd.f32 %v1433_v3, %v749_v9  ;;  %v741_v14 = vadd.f32 %v740_v11, %v595_v56  ;;  %v823_v22 = vmax.f32 %v807_v12, 0.0 }
 0x1b6   :  { %v1173_v15 = vpop.f32.mrf.mxu0 }
 0x1b7   :  { %v826_v17 = vmax.f32 %v810_v13, 0.0  ;;  %v808_v18 = vadd.f32 %v1433_v3, %v741_v14  ;;  %v762_v19 = vadd.f32 %v1173_v15, %v1141_v57 }
 0x1b8   :  { %v753_v21 = vpop.f32.mrf.mxu0 }
 0x1b9   :  { %v1000_v23 = vpack.c.bf16 %v826_v17, %v825_v16  ;;  %v824_v24 = vmax.f32 %v808_v18, 0.0  ;;  %v754_v25 = vadd.f32 %v753_v21, %v608_v58  ;;  %v813_v28 = vadd.f32 %v1433_v3, %v762_v19 }
 0x1ba   :  { %v1174_v26 = vpop.f32.mrf.mxu0 }
 0x1bb   :  { %1032 = vst [vmem:[%s1481_s6 + $0x8] sm:$0xff] %v1000_v23   ;;  %v995_v27 = vpack.c.bf16 %v824_v24, %v823_v22  ;;  %v765_v29 = vadd.f32 %v1174_v26, %v1142_v59  ;;  %v811_v32 = vadd.f32 %v1433_v3, %v754_v25  ;;  %v829_v36 = vmax.f32 %v813_v28, 0.0 }
 0x1bc   :  { %v756_v31 = vpop.f32.mrf.mxu0 }
 0x1bd   :  { %996 = vst [vmem:[%s1481_s6] sm:$0xff] %v995_v27   ;;  %v814_v33 = vadd.f32 %v1433_v3, %v765_v29  ;;  %v757_v34 = vadd.f32 %v756_v31, %v611_v60  ;;  %v827_v41 = vmax.f32 %v811_v32, 0.0 }
 0x1be   :  { %v1177_v35 = vpop.f32.mrf.mxu1 }
 0x1bf   :  { %v830_v37 = vmax.f32 %v814_v33, 0.0  ;;  %v812_v38 = vadd.f32 %v1433_v3, %v757_v34  ;;  %v778_v39 = vadd.f32 %v1177_v35, %v1145_v61 }
 0x1c0   :  { %v769_v40 = vpop.f32.mrf.mxu1 }
 0x1c1   :  { %v1010_v42 = vpack.c.bf16 %v830_v37, %v829_v36  ;;  %v828_v43 = vmax.f32 %v812_v38, 0.0  ;;  %v770_v44 = vadd.f32 %v769_v40, %v624_v62  ;;  %v817_v47 = vadd.f32 %v1433_v3, %v778_v39 }
 0x1c2   :  { %v1178_v45 = vpop.f32.mrf.mxu1 }
 0x1c3   :  { %1034 = vst [vmem:[%s1481_s6 + $0x18] sm:$0xff] %v1010_v42   ;;  %v1005_v46 = vpack.c.bf16 %v828_v43, %v827_v41  ;;  %v781_v48 = vadd.f32 %v1178_v45, %v1146_v63  ;;  %v815_v50 = vadd.f32 %v1433_v3, %v770_v44  ;;  %v833_v54 = vmax.f32 %v817_v47, 0.0 }
 0x1c4   :  { %v772_v49 = vpop.f32.mrf.mxu1 }
 0x1c5   :  { %1033 = vst [vmem:[%s1481_s6 + $0x10] sm:$0xff] %v1005_v46   ;;  %v818_v51 = vadd.f32 %v1433_v3, %v781_v48  ;;  %v773_v52 = vadd.f32 %v772_v49, %v627_v0  ;;  %v831_v59 = vmax.f32 %v815_v50, 0.0 }
 0x1c6   :  { %v1181_v53 = vpop.f32.mrf.mxu1 }
 0x1c7   :  { %v834_v55 = vmax.f32 %v818_v51, 0.0  ;;  %v816_v56 = vadd.f32 %v1433_v3, %v773_v52  ;;  %v794_v57 = vadd.f32 %v1181_v53, %v1149_v4 }
 0x1c8   :  { %v785_v58 = vpop.f32.mrf.mxu1 }
 0x1c9   :  { %v1020_v60 = vpack.c.bf16 %v834_v55, %v833_v54  ;;  %v832_v61 = vmax.f32 %v816_v56, 0.0  ;;  %v786_v62 = vadd.f32 %v785_v58, %v640_v10  ;;  %v821_v2 = vadd.f32 %v1433_v3, %v794_v57 }
 0x1ca   :  { %v1182_v63 = vpop.f32.mrf.mxu1 }
 0x1cb   :  { %1036 = vst [vmem:[%s1481_s6 + $0x28] sm:$0xff] %v1020_v60   ;;  %v1015_v1 = vpack.c.bf16 %v832_v61, %v831_v59  ;;  %v797_v0 = vadd.f32 %v1182_v63, %v1150_v20  ;;  %v819_v4 = vadd.f32 %v1433_v3, %v786_v62  ;;  %v837_v8 = vmax.f32 %v821_v2, 0.0 }
 0x1cc   :  { %v788_v5 = vpop.f32.mrf.mxu1 }
 0x1cd   :  { %1035 = vst [vmem:[%s1481_s6 + $0x20] sm:$0xff] %v1015_v1   ;;  %v822_v6 = vadd.f32 %v1433_v3, %v797_v0  ;;  %v789_v7 = vadd.f32 %v788_v5, %v643_v30  ;;  %v835_v11 = vmax.f32 %v819_v4, 0.0 }
 0x1cf   :  { %v838_v9 = vmax.f32 %v822_v6, 0.0  ;;  %v820_v10 = vadd.f32 %v1433_v3, %v789_v7 }
 0x1d1   :  { %v1030_v12 = vpack.c.bf16 %v838_v9, %v837_v8  ;;  %v836_v13 = vmax.f32 %v820_v10, 0.0 }
 0x1d3   :  { %1038 = vst [vmem:[%s1481_s6 + $0x38] sm:$0xff] %v1030_v12   ;;  %v1025_v14 = vpack.c.bf16 %v836_v13, %v835_v11 }
 0x1d5   :  { %1037 = vst [vmem:[%s1481_s6 + $0x30] sm:$0xff] %v1025_v14  }

// kernel: gnn_forward.5
= control target key start
LH: loop header
LB: loop body
LE: loop exit
PB: predicated region body
PF: predicated region fallthrough
CT: control target
= control target key end

     0   :  { %v1091_v1 = vmov 0   ;;  %s1356_s1 = inlined_call_operand.vmem [shape: bf16[128,128], index: 1, kind: input, shape index: {}]   ;;  %s1357_s0 = inlined_call_operand.vmem [shape: s8[128,128], index: 0, kind: input, shape index: {}]   ;;  %s1358_s2 = inlined_call_operand.vmem [shape: f32[128,1], index: 2, kind: input, shape index: {}]   ;;  %s1359_s4 = inlined_call_operand.vmem [shape: bf16[128,128], index: 4, kind: input, shape index: {}]   ;;  %s1360_s3 = inlined_call_operand.vmem [shape: bf16[128,128], index: 3, kind: input, shape index: {}]   ;;  %s1361_s5 = inlined_call_operand.vmem [shape: f32[1,128], index: 5, kind: input, shape index: {}]   ;;  %s1362_s6 = inlined_call_operand.vmem [shape: f32[128,128], index: 6, kind: output, shape index: {}]  }
   0x1   :  { %v1059_v0 = vld [vmem:[%s1356_s1 + $0x38] sm:$0xff]   ;;  %1058 = vset.pattern.permute.xlu1 %v1091_v1  ;;  %1057 = vset.pattern.permute.xlu0 %v1091_v1  ;;  %v1060_v2 = vld [vmem:[%s1356_s1 + $0x30] sm:$0xff]   ;;  %v1061_v3 = vld [vmem:[%s1356_s1 + $0x28] sm:$0xff]  }
   0x2   :  { %944 = vmatprep.subr.bf16.mxu0 %v1059_v0  ;;  %v1062_v4 = vld [vmem:[%s1356_s1 + $0x20] sm:$0xff]   ;;  %v298_v9 = vld [vmem:[%s1358_s2 + $0x48] sm:$0xff]  ;;  %v1063_v11 = vld [vmem:[%s1356_s1 + $0x18] sm:$0xff]  }
   0x3   :  { %945 = vmatpush3.bf16.msra.mxu0 %v1059_v0  ;;  %v1142_v5 = vld [vmem:[%s1357_s0] sm:$0xff]  ;;  %v290_v10 = vld [vmem:[%s1358_s2 + $0x8] sm:$0xff]  ;;  %v1064_v12 = vld [vmem:[%s1356_s1 + $0x10] sm:$0xff]  }
   0x4   :  { %946 = vmatprep.subr.bf16.mxu0 %v1060_v2  ;;  %v69_v6 = vunpack.c.l.s8.bf16 %v1142_v5  ;;  %v297_v7 = vld [vmem:[%s1358_s2 + $0x40] sm:$0xff]  ;;  %v292_v13 = vld [vmem:[%s1358_s2 + $0x18] sm:$0xff]  ;;  %v291_v14 = vld [vmem:[%s1358_s2 + $0x10] sm:$0xff]  ;;  %v70_v32 = vunpack.c.h.s8.bf16 %v1142_v5 }
   0x5   :  { %v289_v8 = vld [vmem:[%s1358_s2] sm:$0xff]  ;;  %347 = vperm.xlu1 %1058, %v297_v7   ;;  %v1067_v15 = vld [vmem:[%s1359_s4 + $0x38] sm:$0xff]   ;;  %v1068_v16 = vld [vmem:[%s1359_s4 + $0x30] sm:$0xff]  }
   0x6   :  { %307 = vperm.xlu0 %1057, %v289_v8   ;;  %960 = vmatprep.mubr.bf16.mxu0 %v69_v6  ;;  %v1065_v17 = vld [vmem:[%s1356_s1 + $0x8] sm:$0xff]   ;;  %v300_v18 = vld [vmem:[%s1358_s2 + $0x58] sm:$0xff]  ;;  %v299_v19 = vld [vmem:[%s1358_s2 + $0x50] sm:$0xff] }
   0x7   :  { %947 = vmatpush3.bf16.msra.mxu0 %v1060_v2  ;;  %976 = vmatprep.subr.bf16.mxu1 %v1067_v15  ;;  %v1069_v20 = vld [vmem:[%s1359_s4 + $0x28] sm:$0xff]   ;;  %v1066_v21 = vld [vmem:[%s1356_s1] sm:$0xff]   ;;  %v1071_v29 = vld [vmem:[%s1359_s4 + $0x18] sm:$0xff]  }
   0x8   :  { %948 = vmatprep.subr.bf16.mxu0 %v1061_v3  ;;  %977 = vmatpush3.bf16.msra.mxu1 %v1067_v15  ;;  %v294_v22 = vld [vmem:[%s1358_s2 + $0x28] sm:$0xff]  ;;  %v293_v23 = vld [vmem:[%s1358_s2 + $0x20] sm:$0xff]  ;;  %v1073_v30 = vld [vmem:[%s1360_s3 + $0x38] sm:$0xff]  }
   0x9   :  { %352 = vperm.xlu1 %1058, %v298_v9   ;;  %978 = vmatprep.subr.bf16.mxu1 %v1068_v16  ;;  %v1070_v24 = vld [vmem:[%s1359_s4 + $0x20] sm:$0xff]   ;;  %v302_v25 = vld [vmem:[%s1358_s2 + $0x68] sm:$0xff]  ;;  %v296_v31 = vld [vmem:[%s1358_s2 + $0x38] sm:$0xff] }
   0xa   :  { %312 = vperm.xlu0 %1057, %v290_v10   ;;  %v301_v26 = vld [vmem:[%s1358_s2 + $0x60] sm:$0xff]  ;;  %v66_v27 = vld [vmem:[%s1357_s0 + $0x8] sm:$0xff]  ;;  %v295_v33 = vld [vmem:[%s1358_s2 + $0x30] sm:$0xff] }
   0xb   :  { %949 = vmatpush3.bf16.msra.mxu0 %v1061_v3  ;;  %v1078_v28 = vld [vmem:[%s1356_s1] sm:$0xff]   ;;  %v71_v34 = vunpack.c.l.s8.bf16 %v66_v27  ;;  %v1072_v35 = vld [vmem:[%s1359_s4 + $0x10] sm:$0xff]   ;;  %v304_v37 = vld [vmem:[%s1358_s2 + $0x78] sm:$0xff]  ;;  %v72_v42 = vunpack.c.h.s8.bf16 %v66_v27 }
   0xc   :  { %950 = vmatprep.subr.bf16.mxu0 %v1062_v4  ;;  %979 = vmatpush3.bf16.msra.mxu1 %v1068_v16  ;;  %v1075_v36 = vld [vmem:[%s1360_s3 + $0x30] sm:$0xff]   ;;  %v1074_v40 = vld [vmem:[%s1359_s4 + $0x8] sm:$0xff]   ;;  %v1076_v44 = vld [vmem:[%s1359_s4] sm:$0xff]  }
   0xd   :  { %322 = vperm.xlu1 %1058, %v292_v13   ;;  %980 = vmatprep.subr.bf16.mxu1 %v1069_v20  ;;  %v67_v38 = vld [vmem:[%s1357_s0 + $0x10] sm:$0xff]  ;;  %v1077_v41 = vld [vmem:[%s1360_s3 + $0x28] sm:$0xff]   ;;  %v1080_v45 = vld [vmem:[%s1360_s3 + $0x20] sm:$0xff]  }
   0xe   :  { %317 = vperm.xlu0 %1057, %v291_v14   ;;  %992 = vmatprep.mubr.bf16.mxu1 %v1078_v28  ;;  %v303_v39 = vld [vmem:[%s1358_s2 + $0x70] sm:$0xff]  ;;  %v73_v43 = vunpack.c.l.s8.bf16 %v67_v38  ;;  %v68_v46 = vld [vmem:[%s1357_s0 + $0x18] sm:$0xff]  ;;  %v74_v48 = vunpack.c.h.s8.bf16 %v67_v38  ;;  %v1079_v50 = vld [vmem:[%s1356_s1 + $0x8] sm:$0xff]  }
   0xf   :  { %951 = vmatpush3.bf16.msra.mxu0 %v1062_v4  ;;  %v1081_v47 = vld [vmem:[%s1360_s3 + $0x18] sm:$0xff]   ;;  %v75_v49 = vunpack.c.l.s8.bf16 %v68_v46  ;;  %v1082_v51 = vld [vmem:[%s1356_s1 + $0x10] sm:$0xff]   ;;  %v76_v52 = vunpack.c.h.s8.bf16 %v68_v46  ;;  %v1085_v55 = vld [vmem:[%s1360_s3 + $0x8] sm:$0xff]  }
  0x10   :  { %952 = vmatprep.subr.bf16.mxu0 %v1063_v11  ;;  %981 = vmatpush3.bf16.msra.mxu1 %v1069_v20  ;;  %v1083_v53 = vld [vmem:[%s1356_s1 + $0x18] sm:$0xff]   ;;  %v1084_v54 = vld [vmem:[%s1360_s3 + $0x10] sm:$0xff]   ;;  %v1086_v56 = vld [vmem:[%s1356_s1 + $0x20] sm:$0xff]  }
  0x11   :  { %362 = vperm.xlu1 %1058, %v300_v18   ;;  %982 = vmatprep.subr.bf16.mxu1 %v1070_v24  ;;  %v1087_v57 = vld [vmem:[%s1356_s1 + $0x28] sm:$0xff]   ;;  %v1088_v58 = vld [vmem:[%s1360_s3] sm:$0xff]   ;;  %v1089_v59 = vld [vmem:[%s1356_s1 + $0x30] sm:$0xff]  }
  0x12   :  { %357 = vperm.xlu0 %1057, %v299_v19   ;;  %v1090_v60 = vld [vmem:[%s1356_s1 + $0x38] sm:$0xff]  }
  0x13   :  { %953 = vmatpush3.bf16.msra.mxu0 %v1063_v11 }
  0x14   :  { %954 = vmatprep.subr.bf16.mxu0 %v1064_v12  ;;  %983 = vmatpush3.bf16.msra.mxu1 %v1070_v24 }
  0x15   :  { %332 = vperm.xlu1 %1058, %v294_v22   ;;  %984 = vmatprep.subr.bf16.mxu1 %v1071_v29 }
  0x16   :  { %327 = vperm.xlu0 %1057, %v293_v23  }
  0x17   :  { %955 = vmatpush3.bf16.msra.mxu0 %v1064_v12 }
  0x18   :  { %956 = vmatprep.subr.bf16.mxu0 %v1065_v17  ;;  %985 = vmatpush3.bf16.msra.mxu1 %v1071_v29 }
  0x19   :  { %372 = vperm.xlu1 %1058, %v302_v25   ;;  %986 = vmatprep.subr.bf16.mxu1 %v1072_v35 }
  0x1a   :  { %367 = vperm.xlu0 %1057, %v301_v26  }
  0x1b   :  { %957 = vmatpush3.bf16.msra.mxu0 %v1065_v17 }
  0x1c   :  { %958 = vmatprep.subr.bf16.mxu0 %v1066_v21  ;;  %987 = vmatpush3.bf16.msra.mxu1 %v1072_v35 }
  0x1d   :  { %342 = vperm.xlu1 %1058, %v296_v31   ;;  %988 = vmatprep.subr.bf16.mxu1 %v1074_v40 }
  0x1e   :  { %337 = vperm.xlu0 %1057, %v295_v33  }
  0x1f   :  { %959 = vmatpush3.bf16.msra.mxu0 %v1066_v21 }
  0x20   :  { %1008 = vmatprep.subr.bf16.mxu0 %v1073_v30  ;;  %989 = vmatpush3.bf16.msra.mxu1 %v1074_v40 }
  0x21   :  { %382 = vperm.xlu1 %1058, %v304_v37   ;;  %990 = vmatprep.subr.bf16.mxu1 %v1076_v44 }
  0x22   :  { %961 = vmatmul.mubr.bf16.vlgmr.msra.gmra.mxu0 %v70_v32  ;;  %377 = vperm.xlu0 %1057, %v303_v39  }
  0x23   :  { %964 = vmatprep.mubr.bf16.mxu0 %v71_v34  ;;  %1009 = vmatpush3.bf16.msra.mxu0 %v1073_v30 }
  0x24   :  { %1010 = vmatprep.subr.bf16.mxu0 %v1075_v36  ;;  %991 = vmatpush3.bf16.msra.mxu1 %v1076_v44 }
  0x25   :  { %1040 = vmatprep.subr.bf16.mxu1 %v1073_v30 }
  0x27   :  { %1011 = vmatpush3.bf16.msra.mxu0 %v1075_v36  ;;  %993 = vmatmul.mubr.bf16.vlgmr.msra.gmra.mxu1 %v1079_v50 }
  0x28   :  { %1012 = vmatprep.subr.bf16.mxu0 %v1077_v41  ;;  %1048 = vmatpush3.bf16.msra.mxu1 %v1073_v30 }
  0x29   :  { %996 = vmatprep.mubr.bf16.mxu1 %v1082_v51  ;;  %1041 = vmatprep.subr.bf16.mxu1 %v1075_v36 }
  0x2a   :  { %965 = vmatmul.mubr.bf16.gmra.mxu0 %v72_v42 }
  0x2b   :  { %968 = vmatprep.mubr.bf16.mxu0 %v73_v43  ;;  %1013 = vmatpush3.bf16.msra.mxu0 %v1077_v41 }
  0x2c   :  { %1014 = vmatprep.subr.bf16.mxu0 %v1080_v45  ;;  %1049 = vmatpush3.bf16.msra.mxu1 %v1075_v36 }
  0x2d   :  { %1042 = vmatprep.subr.bf16.mxu1 %v1077_v41 }
  0x2f   :  { %1015 = vmatpush3.bf16.msra.mxu0 %v1080_v45  ;;  %997 = vmatmul.mubr.bf16.gmra.mxu1 %v1083_v53 }
  0x30   :  { %1016 = vmatprep.subr.bf16.mxu0 %v1081_v47  ;;  %1050 = vmatpush3.bf16.msra.mxu1 %v1077_v41 }
  0x31   :  { %1043 = vmatprep.subr.bf16.mxu1 %v1080_v45  ;;  %1000 = vmatprep.mubr.bf16.mxu1 %v1086_v56 }
  0x32   :  { %969 = vmatmul.mubr.bf16.gmra.mxu0 %v74_v48 }
  0x33   :  { %972 = vmatprep.mubr.bf16.mxu0 %v75_v49  ;;  %1017 = vmatpush3.bf16.msra.mxu0 %v1081_v47 }
  0x34   :  { %1051 = vmatpush3.bf16.msra.mxu1 %v1080_v45  ;;  %1018 = vmatprep.subr.bf16.mxu0 %v1084_v54 }
  0x35   :  { %1044 = vmatprep.subr.bf16.mxu1 %v1081_v47 }
  0x37   :  { %1019 = vmatpush3.bf16.msra.mxu0 %v1084_v54  ;;  %1001 = vmatmul.mubr.bf16.gmra.mxu1 %v1087_v57 }
  0x38   :  { %1052 = vmatpush3.bf16.msra.mxu1 %v1081_v47  ;;  %1020 = vmatprep.subr.bf16.mxu0 %v1085_v55 }
  0x39   :  { %1045 = vmatprep.subr.bf16.mxu1 %v1084_v54  ;;  %1004 = vmatprep.mubr.bf16.mxu1 %v1089_v59 }
  0x3a   :  { %973 = vmatmul.mubr.bf16.gmra.mxu0 %v76_v52 }
  0x3b   :  { %1021 = vmatpush3.bf16.msra.mxu0 %v1085_v55 }
  0x3c   :  { %1053 = vmatpush3.bf16.msra.mxu1 %v1084_v54  ;;  %1022 = vmatprep.subr.bf16.mxu0 %v1088_v58 }
  0x3d   :  { %1046 = vmatprep.subr.bf16.mxu1 %v1085_v55 }
  0x3f   :  { %1023 = vmatpush3.bf16.msra.mxu0 %v1088_v58  ;;  %1005 = vmatmul.mubr.bf16.gmra.mxu1 %v1090_v60 }
  0x40   :  { %1054 = vmatpush3.bf16.msra.mxu1 %v1085_v55 }
  0x41   :  { %1047 = vmatprep.subr.bf16.mxu1 %v1088_v58 }
  0x44   :  { %1055 = vmatpush3.bf16.msra.mxu1 %v1088_v58 }
  0x80   :  { %v348_v61 = vpop.permute.xlu1 %347 }
  0x81   :  { %v308_v62 = vpop.permute.xlu0 %307 }
  0x84   :  { %v353_v63 = vpop.permute.xlu1 %352 }
  0x85   :  { %v313_v0 = vpop.permute.xlu0 %312 }
  0x88   :  { %v323_v1 = vpop.permute.xlu1 %322 }
  0x89   :  { %v318_v2 = vpop.permute.xlu0 %317 }
  0x8c   :  { %v363_v3 = vpop.permute.xlu1 %362 }
  0x8d   :  { %v358_v4 = vpop.permute.xlu0 %357 }
  0x90   :  { %v333_v6 = vpop.permute.xlu1 %332 }
  0x91   :  { %v328_v8 = vpop.permute.xlu0 %327 }
  0x94   :  { %v373_v12 = vpop.permute.xlu1 %372 }
  0x95   :  { %v368_v17 = vpop.permute.xlu0 %367 }
  0x98   :  { %v343_v22 = vpop.permute.xlu1 %342 }
  0x99   :  { %v338_v25 = vpop.permute.xlu0 %337 }
  0x9c   :  { %v383_v44 = vpop.permute.xlu1 %382 }
  0x9d   :  { %v378_v47 = vpop.permute.xlu0 %377 }
  0xe2   :  { %v962_v5 = vpop.f32.mrf.mxu0 }
  0xe3   :  { %v387_v15 = vmul.f32 %v962_v5, %v318_v2  ;;  %v1290_v2 = vld [vmem:[%s1361_s5] ss:$0 sm:$0xff] }
  0xe4   :  { %v175_v7 = vpop.f32.mrf.mxu0 }
  0xe5   :  { %v385_v13 = vmul.f32 %v308_v62, %v175_v7 }
  0xe6   :  { %v963_v9 = vpop.f32.mrf.mxu0 }
  0xe7   :  { %v388_v10 = vmul.f32 %v963_v9, %v323_v1  ;;  %v994_v53 = vpop.f32.mrf.mxu1 }
  0xe8   :  { %v178_v11 = vpop.f32.mrf.mxu0 }
  0xe9   :  { %v386_v14 = vmul.f32 %v313_v0, %v178_v11  ;;  %v402_v19 = vpack.c.bf16 %v388_v10, %v387_v15  ;;  %v592_v54 = vpop.f32.mrf.mxu1 }
  0xea   :  { %v966_v16 = vpop.f32.mrf.mxu0 }
  0xeb   :  { %v401_v18 = vpack.c.bf16 %v386_v14, %v385_v13  ;;  %v391_v28 = vmul.f32 %v966_v16, %v338_v25  ;;  %v995_v55 = vpop.f32.mrf.mxu1 }
  0xec   :  { %v191_v20 = vpop.f32.mrf.mxu0 }
  0xed   :  { %1024 = vmatprep.mubr.bf16.mxu0 %v401_v18  ;;  %v389_v26 = vmul.f32 %v328_v8, %v191_v20  ;;  %v595_v56 = vpop.f32.mrf.mxu1 }
  0xee   :  { %v967_v21 = vpop.f32.mrf.mxu0  ;;  %1025 = vmatmul.mubr.bf16.vlgmr.msra.gmra.mxu0 %v402_v19 }
  0xef   :  { %v392_v23 = vmul.f32 %v967_v21, %v343_v22  ;;  %v998_v57 = vpop.f32.mrf.mxu1 }
  0xf0   :  { %v194_v24 = vpop.f32.mrf.mxu0 }
  0xf1   :  { %v390_v27 = vmul.f32 %v333_v6, %v194_v24  ;;  %v404_v31 = vpack.c.bf16 %v392_v23, %v391_v28  ;;  %v608_v58 = vpop.f32.mrf.mxu1 }
  0xf2   :  { %v970_v29 = vpop.f32.mrf.mxu0 }
  0xf3   :  { %v403_v30 = vpack.c.bf16 %v390_v27, %v389_v26  ;;  %v395_v38 = vmul.f32 %v970_v29, %v358_v4  ;;  %v999_v59 = vpop.f32.mrf.mxu1 }
  0xf4   :  { %v207_v32 = vpop.f32.mrf.mxu0 }
  0xf5   :  { %1028 = vmatprep.mubr.bf16.mxu0 %v403_v30  ;;  %v393_v36 = vmul.f32 %v348_v61, %v207_v32  ;;  %v611_v60 = vpop.f32.mrf.mxu1 }
  0xf6   :  { %v971_v33 = vpop.f32.mrf.mxu0  ;;  %1029 = vmatmul.mubr.bf16.gmra.mxu0 %v404_v31 }
  0xf7   :  { %v396_v34 = vmul.f32 %v971_v33, %v363_v3  ;;  %v1002_v61 = vpop.f32.mrf.mxu1 }
  0xf8   :  { %v210_v35 = vpop.f32.mrf.mxu0 }
  0xf9   :  { %v394_v37 = vmul.f32 %v353_v63, %v210_v35  ;;  %v406_v41 = vpack.c.bf16 %v396_v34, %v395_v38  ;;  %v624_v62 = vpop.f32.mrf.mxu1 }
  0xfa   :  { %v974_v39 = vpop.f32.mrf.mxu0 }
  0xfb   :  { %v405_v40 = vpack.c.bf16 %v394_v37, %v393_v36  ;;  %v399_v50 = vmul.f32 %v974_v39, %v378_v47  ;;  %v1003_v63 = vpop.f32.mrf.mxu1 }
  0xfc   :  { %v223_v42 = vpop.f32.mrf.mxu0 }
  0xfd   :  { %1032 = vmatprep.mubr.bf16.mxu1 %v405_v40  ;;  %v397_v48 = vmul.f32 %v368_v17, %v223_v42  ;;  %v627_v0 = vpop.f32.mrf.mxu1 }
  0xfe   :  { %v975_v43 = vpop.f32.mrf.mxu0  ;;  %1033 = vmatmul.mubr.bf16.vlgmr.msra.gmra.mxu1 %v406_v41 }
  0xff   :  { %v400_v45 = vmul.f32 %v975_v43, %v383_v44  ;;  %v1006_v4 = vpop.f32.mrf.mxu1 }
 0x100   :  { %v226_v46 = vpop.f32.mrf.mxu0 }
 0x101   :  { %v398_v49 = vmul.f32 %v373_v12, %v226_v46  ;;  %v408_v52 = vpack.c.bf16 %v400_v45, %v399_v50  ;;  %v640_v12 = vpop.f32.mrf.mxu1 }
 0x103   :  { %v407_v51 = vpack.c.bf16 %v398_v49, %v397_v48  ;;  %v1007_v21 = vpop.f32.mrf.mxu1 }
 0x105   :  { %1036 = vmatprep.mubr.bf16.mxu1 %v407_v51  ;;  %v643_v30 = vpop.f32.mrf.mxu1 }
 0x106   :  { %1037 = vmatmul.mubr.bf16.gmra.mxu1 %v408_v52 }
 0x1ae   :  { %v1026_v1 = vpop.f32.mrf.mxu0 }
 0x1af   :  { %v746_v3 = vadd.f32 %v1026_v1, %v994_v53 }
 0x1b0   :  { %v737_v5 = vpop.f32.mrf.mxu0 }
 0x1b1   :  { %v809_v6 = vadd.f32 %v1290_v2, %v746_v3  ;;  %v738_v7 = vadd.f32 %v737_v5, %v592_v54 }
 0x1b2   :  { %v1027_v8 = vpop.f32.mrf.mxu0 }
 0x1b3   :  { %v825_v9 = vmax.f32 %v809_v6, 0.0  ;;  %v807_v10 = vadd.f32 %v1290_v2, %v738_v7  ;;  %v749_v11 = vadd.f32 %v1027_v8, %v995_v55 }
 0x1b4   :  { %v740_v13 = vpop.f32.mrf.mxu0 }
 0x1b5   :  { %841 = vst [vmem:[%s1362_s6 + $0x10] sm:$0xff] %v825_v9  ;;  %v823_v14 = vmax.f32 %v807_v10, 0.0  ;;  %v810_v15 = vadd.f32 %v1290_v2, %v749_v11  ;;  %v741_v16 = vadd.f32 %v740_v13, %v595_v56 }
 0x1b6   :  { %v1030_v17 = vpop.f32.mrf.mxu0 }
 0x1b7   :  { %839 = vst [vmem:[%s1362_s6] sm:$0xff] %v823_v14  ;;  %v826_v18 = vmax.f32 %v810_v15, 0.0  ;;  %v808_v19 = vadd.f32 %v1290_v2, %v741_v16  ;;  %v762_v20 = vadd.f32 %v1030_v17, %v998_v57 }
 0x1b8   :  { %v753_v22 = vpop.f32.mrf.mxu0 }
 0x1b9   :  { %842 = vst [vmem:[%s1362_s6 + $0x18] sm:$0xff] %v826_v18  ;;  %v824_v23 = vmax.f32 %v808_v19, 0.0  ;;  %v813_v24 = vadd.f32 %v1290_v2, %v762_v20  ;;  %v754_v25 = vadd.f32 %v753_v22, %v608_v58 }
 0x1ba   :  { %v1031_v26 = vpop.f32.mrf.mxu0 }
 0x1bb   :  { %840 = vst [vmem:[%s1362_s6 + $0x8] sm:$0xff] %v824_v23  ;;  %v829_v27 = vmax.f32 %v813_v24, 0.0  ;;  %v811_v28 = vadd.f32 %v1290_v2, %v754_v25  ;;  %v765_v29 = vadd.f32 %v1031_v26, %v999_v59 }
 0x1bc   :  { %v756_v31 = vpop.f32.mrf.mxu0 }
 0x1bd   :  { %845 = vst [vmem:[%s1362_s6 + $0x30] sm:$0xff] %v829_v27  ;;  %v827_v32 = vmax.f32 %v811_v28, 0.0  ;;  %v814_v33 = vadd.f32 %v1290_v2, %v765_v29  ;;  %v757_v34 = vadd.f32 %v756_v31, %v611_v60 }
 0x1be   :  { %v1034_v35 = vpop.f32.mrf.mxu1 }
 0x1bf   :  { %843 = vst [vmem:[%s1362_s6 + $0x20] sm:$0xff] %v827_v32  ;;  %v830_v36 = vmax.f32 %v814_v33, 0.0  ;;  %v812_v37 = vadd.f32 %v1290_v2, %v757_v34  ;;  %v778_v38 = vadd.f32 %v1034_v35, %v1002_v61 }
 0x1c0   :  { %v769_v39 = vpop.f32.mrf.mxu1 }
 0x1c1   :  { %846 = vst [vmem:[%s1362_s6 + $0x38] sm:$0xff] %v830_v36  ;;  %v828_v40 = vmax.f32 %v812_v37, 0.0  ;;  %v817_v41 = vadd.f32 %v1290_v2, %v778_v38  ;;  %v770_v42 = vadd.f32 %v769_v39, %v624_v62 }
 0x1c2   :  { %v1035_v43 = vpop.f32.mrf.mxu1 }
 0x1c3   :  { %844 = vst [vmem:[%s1362_s6 + $0x28] sm:$0xff] %v828_v40  ;;  %v833_v44 = vmax.f32 %v817_v41, 0.0  ;;  %v815_v45 = vadd.f32 %v1290_v2, %v770_v42  ;;  %v781_v46 = vadd.f32 %v1035_v43, %v1003_v63 }
 0x1c4   :  { %v772_v47 = vpop.f32.mrf.mxu1 }
 0x1c5   :  { %849 = vst [vmem:[%s1362_s6 + $0x50] sm:$0xff] %v833_v44  ;;  %v831_v48 = vmax.f32 %v815_v45, 0.0  ;;  %v818_v49 = vadd.f32 %v1290_v2, %v781_v46  ;;  %v773_v50 = vadd.f32 %v772_v47, %v627_v0 }
 0x1c6   :  { %v1038_v51 = vpop.f32.mrf.mxu1 }
 0x1c7   :  { %847 = vst [vmem:[%s1362_s6 + $0x40] sm:$0xff] %v831_v48  ;;  %v834_v52 = vmax.f32 %v818_v49, 0.0  ;;  %v816_v53 = vadd.f32 %v1290_v2, %v773_v50  ;;  %v794_v54 = vadd.f32 %v1038_v51, %v1006_v4 }
 0x1c8   :  { %v785_v55 = vpop.f32.mrf.mxu1 }
 0x1c9   :  { %850 = vst [vmem:[%s1362_s6 + $0x58] sm:$0xff] %v834_v52  ;;  %v832_v56 = vmax.f32 %v816_v53, 0.0  ;;  %v821_v57 = vadd.f32 %v1290_v2, %v794_v54  ;;  %v786_v58 = vadd.f32 %v785_v55, %v640_v12 }
 0x1ca   :  { %v1039_v59 = vpop.f32.mrf.mxu1 }
 0x1cb   :  { %848 = vst [vmem:[%s1362_s6 + $0x48] sm:$0xff] %v832_v56  ;;  %v837_v60 = vmax.f32 %v821_v57, 0.0  ;;  %v819_v61 = vadd.f32 %v1290_v2, %v786_v58  ;;  %v797_v62 = vadd.f32 %v1039_v59, %v1007_v21 }
 0x1cc   :  { %v788_v63 = vpop.f32.mrf.mxu1 }
 0x1cd   :  { %853 = vst [vmem:[%s1362_s6 + $0x70] sm:$0xff] %v837_v60  ;;  %v835_v0 = vmax.f32 %v819_v61, 0.0  ;;  %v822_v1 = vadd.f32 %v1290_v2, %v797_v62  ;;  %v789_v3 = vadd.f32 %v788_v63, %v643_v30 }
 0x1cf   :  { %851 = vst [vmem:[%s1362_s6 + $0x60] sm:$0xff] %v835_v0  ;;  %v838_v4 = vmax.f32 %v822_v1, 0.0  ;;  %v820_v5 = vadd.f32 %v1290_v2, %v789_v3 }
 0x1d1   :  { %854 = vst [vmem:[%s1362_s6 + $0x78] sm:$0xff] %v838_v4  ;;  %v836_v6 = vmax.f32 %v820_v5, 0.0 }
 0x1d3   :  { %852 = vst [vmem:[%s1362_s6 + $0x68] sm:$0xff] %v836_v6 }

</bundles_post_ra>
